<compile_context>
chip_gen: v7x
topology: tpu7x:2x2x1
jax: 0.10.0
libtpu: 0.0.40
codegen_flags: <defaults>
</compile_context>

<pallas_src>
from functools import partial

import numpy as np
import jax
import jax.numpy as jnp
from jax.experimental import pallas as pl
from jax.experimental.pallas import tpu as pltpu


# ----------------------------- tuning constants -----------------------------
_TARGET_BLOCK_BYTES = 8 * 1024 * 1024    # per x/out block
_VMEM_LIMIT_BYTES = 48 * 1024 * 1024     # safe on v5e/v6e (128 MiB) and v7x (64 MiB)


def _sublane_multiple(dtype):
    """Min second-minor block multiple for the dtype's sublane packing."""
    return {4: 8, 2: 16, 1: 32}.get(jnp.dtype(dtype).itemsize, 8)


def _choose_tm(n_rows, row_bytes, dtype, target_bytes=_TARGET_BLOCK_BYTES):
    """Rows per block:
       * ~target_bytes per buffer (amortizes ~0.35us per-grid-step overhead),
       * multiple of the dtype's sublane packing (8 f32 / 16 bf16 / 32 int8),
       * at least 2 grid steps when possible, so v7x's two TensorCores both
         get work (no effect on single-TC v5e/v6e)."""
    m = _sublane_multiple(dtype)
    tm = max(1, target_bytes // max(1, row_bytes))
    if tm >= n_rows:
        if n_rows >= 2 * m:
            half = (n_rows + 1) // 2
            return min(((half + m - 1) // m) * m, n_rows)
        return n_rows
    tm = max(m, (tm // m) * m)
    return min(tm, n_rows)


# ------------------------- Pallas kernel (hot path) -------------------------
def _mul_kernel(k_ref, x_ref, o_ref):
    # k_ref: (1, L) precomputed outer-product plane (x.dtype, constant block)
    # x_ref/o_ref: (TM, L) lane-dense rows
    o_ref[...] = (x_ref[...] * k_ref[...]).astype(o_ref.dtype)


def _kernel_plane(wi, wj, size, top, bottom, left, right, out_dtype):
    """Boundary overwrites + outer product, flattened to (1, size*size)."""
    idx = jnp.arange(size)
    wi_mod = wi.astype(jnp.float32)
    wj_mod = wj.astype(jnp.float32)
    if top:
        wi_mod = jnp.where(idx < size // 2, 1.0, wi_mod)
    elif bottom:
        wi_mod = jnp.where(idx >= size // 2, 1.0, wi_mod)
    if left:
        wj_mod = jnp.where(idx < size // 2, 1.0, wj_mod)
    elif right:
        wj_mod = jnp.where(idx >= size // 2, 1.0, wj_mod)
    plane = wi_mod[:, None] * wj_mod[None, :]
    return plane.reshape(1, size * size).astype(out_dtype)


def apply_kernel_flat(x_flat, wi, wj, *, top=False, bottom=False,
                      left=False, right=False):
    """Hot path. x_flat: (N, size*size), lane-dense.

    Prefer this entry point in production (hand in activations already in the
    flattened layout, or call from inside the producer's jit) so no relayout
    copy is materialized around the pallas_call."""
    assert not (top and bottom), "top and bottom are mutually exclusive"
    assert not (left and right), "left and right are mutually exclusive"
    size = wi.shape[0]
    N, L = x_flat.shape
    assert L == size * size

    k_plane = _kernel_plane(wi, wj, size, top, bottom, left, right, x_flat.dtype)

    tm = _choose_tm(N, L * x_flat.dtype.itemsize, x_flat.dtype)
    grid = (pl.cdiv(N, tm),)

    return pl.pallas_call(
        _mul_kernel,
        out_shape=jax.ShapeDtypeStruct((N, L), x_flat.dtype),
        grid=grid,
        in_specs=[
            # Constant-index weight plane: DMA'd once, resident across steps.
            pl.BlockSpec((1, L), lambda i: (0, 0)),
            # x rows; sweep pipeline_mode=pl.Buffered(3) only if a trace shows
            # exposed DMA gaps at step boundaries (VMEM headroom allows it).
            pl.BlockSpec((tm, L), lambda i: (i, 0)),
        ],
        out_specs=pl.BlockSpec((tm, L), lambda i: (i, 0)),
        compiler_params=pltpu.CompilerParams(
            dimension_semantics=("parallel",),
            vmem_limit_bytes=_VMEM_LIMIT_BYTES,
        ),
    )(k_plane, x_flat)


@partial(jax.jit, static_argnames=("top", "bottom", "left", "right"))
def apply_kernel(x, wi, wj, top=False, bottom=False, left=False, right=False):
    """Convenience wrapper matching the PyTorch interface. x: (B, C, size, size).

    The (B,C,s,s)<->(N,s*s) reshapes are kept under this single jit; if x is
    produced by another jitted op, inline this into that jit (or use
    apply_kernel_flat) so XLA can fuse/elide any relayout."""
    B, C, H, W = x.shape
    size = wi.shape[0]
    assert H == size and W == size
    x_flat = x.reshape(B * C, size * size)
    out_flat = apply_kernel_flat(x_flat, wi, wj, top=top, bottom=bottom,
                                 left=left, right=right)
    return out_flat.reshape(B, C, size, size)


# ----------------------------- deterministic init ---------------------------
def init_wi(size):
    # TODO(synk): Kernel._init_wi is abstract in the PyTorch source; use a
    # deterministic Hann window as a concrete stand-in.
    n = np.arange(size, dtype=np.float32)
    return jnp.asarray(0.5 * (1.0 - np.cos(2.0 * np.pi * n / (size - 1))),
                       dtype=jnp.float32)


if __name__ == "__main__":
    size = 16
    B, C = 2, 4

    wi = init_wi(size)
    wj = wi  # wj = wi.clone() in the PyTorch module

    key = jax.random.PRNGKey(0)
    x = jax.random.normal(key, (B, C, size, size), dtype=jnp.float32)

    # Default flags, plus one boundary-flag combination.
    out = apply_kernel(x, wi, wj)
    out_tr = apply_kernel(x, wi, wj, top=True, right=True)
    jax.block_until_ready(out)
    jax.block_until_ready(out_tr)

    # Cross-check against plain-JAX reference of the PyTorch semantics.
    idx = jnp.arange(size)
    ref = x * (wi[:, None] @ wj[None, :])
    wi_t = jnp.where(idx < size // 2, 1.0, wi)
    wj_r = jnp.where(idx >= size // 2, 1.0, wj)
    ref_tr = x * (wi_t[:, None] @ wj_r[None, :])
    assert jnp.allclose(out, ref, atol=1e-6)
    assert jnp.allclose(out_tr, ref_tr, atol=1e-6)

    print("KERNEL_OK")
</pallas_src>

<mosaic_0001>
module attributes {stable_mosaic.version = 11 : i64} {
  func.func @_mul_kernel(%arg0: i32, %arg1: memref<1x256xf32, #tpu.memory_space<vmem>>, %arg2: memref<8x256xf32, #tpu.memory_space<vmem>>, %arg3: memref<8x256xf32, #tpu.memory_space<vmem>>) attributes {dimension_semantics = [#tpu.dimension_semantics<parallel>], iteration_bounds = array<i64: 1>, scalar_prefetch = 0 : i64, scratch_operands = 0 : i64, tpu.core_type = #tpu.core_type<tc>, window_params = [{pipeline_mode = #tpu.pipeline_mode<synchronous>, transform_indices = @transform_0, window_bounds = array<i64: 1, 256>}, {transform_indices = @transform_1, window_bounds = array<i64: 8, 256>}, {transform_indices = @transform_2, window_bounds = array<i64: 8, 256>}]} {
    %c0 = arith.constant 0 : index
    %c0_0 = arith.constant 0 : index
    %0 = vector.load %arg2[%c0, %c0_0] : memref<8x256xf32, #tpu.memory_space<vmem>>, vector<8x256xf32>
    %c0_1 = arith.constant 0 : index
    %c0_2 = arith.constant 0 : index
    %1 = vector.load %arg1[%c0_1, %c0_2] : memref<1x256xf32, #tpu.memory_space<vmem>>, vector<1x256xf32>
    %2 = vector.broadcast %1 : vector<1x256xf32> to vector<8x256xf32>
    %3 = arith.mulf %0, %2 : vector<8x256xf32>
    %c0_3 = arith.constant 0 : index
    %c0_4 = arith.constant 0 : index
    %4 = vector.load %arg3[%c0_3, %c0_4] : memref<8x256xf32, #tpu.memory_space<vmem>>, vector<8x256xf32>
    tpu.vector_store %arg3[%c0_3, %c0_4], %3 {strides = array<i32>} : memref<8x256xf32, #tpu.memory_space<vmem>>, vector<8x256xf32>,
    return
  }
  func.func @transform_0(%arg0: i32) -> (i32, i32) {
    %c0_i32 = arith.constant 0 : i32
    %c0_i32_0 = arith.constant 0 : i32
    %c0_i32_1 = arith.constant 0 : i32
    return %c0_i32, %c0_i32_0 : i32, i32
  }
  func.func @transform_1(%arg0: i32) -> (i32, i32) {
    %c0_i32 = arith.constant 0 : i32
    %c0_i32_0 = arith.constant 0 : i32
    return %arg0, %c0_i32 : i32, i32
  }
  func.func @transform_2(%arg0: i32) -> (i32, i32) {
    %c0_i32 = arith.constant 0 : i32
    %c0_i32_0 = arith.constant 0 : i32
    return %arg0, %c0_i32 : i32, i32
  }
}

</mosaic_0001>

<bundles_post_ra>
// kernel: tpu_custom_call.1
= control target key start
LH: loop header
LB: loop body
LE: loop exit
PB: predicated region body
PF: predicated region fallthrough
CT: control target
= control target key end

     0   :  { %v15_v0 = vlaneseq  ;;  %s63_s0 = inlined_call_operand.vmem [shape: f32[1,256], index: 0, kind: input, shape index: {}]   ;;  %s64_s1 = inlined_call_operand.vmem [shape: f32[8,256], index: 1, kind: input, shape index: {}]   ;;  %s65_s2 = inlined_call_operand.vmem [shape: f32[8,256], index: 2, kind: output, shape index: {}]  }
   0x1   :  { %v13_v2 = vld [vmem:[%s63_s0] sm:$0x3]  ;;  %v12_v6 = vld [vmem:[%s64_s1 + $0x8] sm:$0xff] }
   0x2   :  { %v16_v1 = vshrl.u32 %v15_v0, 7  ;;  %v11_v5 = vld [vmem:[%s64_s1] sm:$0xff] }
   0x4   :  { %v17_v3 = vsub.s32 0, %v16_v1  ;;  %v21_v4 = vsub.s32 1, %v16_v1 }
   0x6   :  { %v18_v7 = vrot.slane %v13_v2, %v17_v3  ;;  %v22_v8 = vrot.slane %v13_v2, %v21_v4 }
   0x8   :  { %v25_v9 = vmul.f32 %v18_v7, %v11_v5  ;;  %v26_v10 = vmul.f32 %v22_v8, %v12_v6 }
   0xa   :  { %27 = vst [vmem:[%s65_s2] sm:$0xff] %v25_v9  ;;  %28 = vst [vmem:[%s65_s2 + $0x8] sm:$0xff] %v26_v10 }

</bundles_post_ra>
